<compile_context>
chip_gen: v5e
topology: v5e:2x2
jax: 0.10.0
libtpu: 0.0.40
codegen_flags: <defaults>
</compile_context>

<pallas_src>
import numpy as np
import jax
import jax.numpy as jnp
from jax.experimental import pallas as pl
from jax.experimental.pallas import tpu as pltpu

SR = 48000
N_FFT = 256          # module: 2048
HOP = 256            # module: 2048
FMIN = 60.0
FMAX = SR / 2.0
FREQ_BINS = N_FFT // 2 + 1
EPS = 1e-5
F_BLOCK = 128        # frequency tile (lane-dense); F is zero-padded to a multiple of this
LOG_SCALE = 10.0 / float(np.log(10.0))   # 10*log10(x) == LOG_SCALE * ln(x)


# ----------------------------------------------------------------------------- host glue
def make_fourier_kernels(n_fft, sr, fmin, fmax):
    """nnAudio create_fourier_kernels(freq_scale='log') with a periodic Hann window."""
    freq_bins = n_fft // 2 + 1
    s = np.arange(n_fft, dtype=np.float64)
    window = 0.5 - 0.5 * np.cos(2.0 * np.pi * s / n_fft)          # hann, fftbins=True
    start_bin = fmin * n_fft / sr
    scaling = np.log(fmax / fmin) / freq_bins
    k = np.arange(freq_bins, dtype=np.float64)[:, None]
    bin_k = start_bin * np.exp(k * scaling)                        # (F, 1), log-spaced
    phase = 2.0 * np.pi * bin_k * s[None, :] / n_fft               # (F, n_fft)
    wcos = (np.cos(phase) * window[None, :]).astype(np.float32)
    wsin = (np.sin(phase) * window[None, :]).astype(np.float32)
    return wcos, wsin


def build_basis_blocks(wcos, wsin, fb=F_BLOCK):
    """(F, n_fft) cos/sin -> (n_fblocks, n_fft, 2*fb) bf16, F zero-padded to mult of fb.

    Per block: columns [:fb] are the cos basis, [fb:] the sin basis, both already
    transposed to (K, N) so the in-kernel matmul is a plain frames @ basis.
    Zero columns (padded bins) give power==0 for both signals -> log-diff == 0.
    """
    f, n_fft = wcos.shape
    f_pad = ((f + fb - 1) // fb) * fb
    cos_t = np.zeros((n_fft, f_pad), np.float32)
    sin_t = np.zeros((n_fft, f_pad), np.float32)
    cos_t[:, :f] = wcos.T
    sin_t[:, :f] = wsin.T
    nfb = f_pad // fb
    blocks = np.stack(
        [np.concatenate([cos_t[:, i * fb:(i + 1) * fb],
                         sin_t[:, i * fb:(i + 1) * fb]], axis=1) for i in range(nfb)],
        axis=0)                                                    # (nfb, n_fft, 2*fb)
    return jnp.asarray(blocks, dtype=jnp.bfloat16), f_pad


def frame_signal(x, n_fft, hop):
    """center=True reflect padding + framing. hop == n_fft -> framing is a reshape."""
    assert hop == n_fft, "non-overlapping frames assumed (module uses hop == n_fft)"
    pad = n_fft // 2
    xp = jnp.pad(x, ((0, 0), (pad, pad)), mode="reflect")
    t = (xp.shape[1] - n_fft) // hop + 1
    return xp[:, : t * n_fft].reshape(x.shape[0], t, n_fft)        # (B, T, n_fft)


# ----------------------------------------------------------------------------- kernel
def edr_diff_kernel(frames_ref, basis_ref, tri2_ref, dmat_ref, out_ref):
    # frames_ref: (1, 2T, n_fft) bf16   rows [0,T)=rir frames, [T,2T)=recon frames
    # basis_ref : (1, n_fft, 2*FB) bf16 cols [0,FB)=cos, [FB,2FB)=sin   (one F block)
    # tri2_ref  : (2T, 2T) f32  block-diag upper-triangular ones (reverse cumsum)
    # dmat_ref  : (T, 2T)  f32  [ I | -I ]  (pairs rir/recon rows)
    # out_ref   : (1, 1, FB) f32 time-summed |10*log10| partial for this (b, f-block)
    fb = out_ref.shape[2]

    frames = frames_ref[0]                       # (2T, n_fft) bf16
    basis = basis_ref[0]                         # (n_fft, 2*FB) bf16

    # One fused STFT matmul on the MXU: (2T, K) @ (K, 2*FB) -> f32
    proj = jnp.dot(frames, basis, preferred_element_type=jnp.float32)
    real = proj[:, :fb]
    imag = proj[:, fb:]
    power = real * real + imag * imag            # |STFT|^2   (2T, FB), VPU

    # Exact reverse cumsum over time for both signals at once (block-diag tri).
    edr = jnp.dot(tri2_ref[...], power, preferred_element_type=jnp.float32)   # (2T, FB)

    # 10*log10((e1+eps)/(e2+eps)) == LOG_SCALE * (ln(e1+eps) - ln(e2+eps))
    log_e = jnp.log(edr + EPS)                   # EUP
    d = jnp.dot(dmat_ref[...], log_e, preferred_element_type=jnp.float32)     # (T, FB)
    out_ref[...] = (LOG_SCALE *
                    jnp.sum(jnp.abs(d), axis=0, keepdims=True)).reshape(1, 1, fb)


def log_edr_difference(rir, recon, basis_blocks, f_orig, n_fft=N_FFT, hop=HOP):
    rir_fr = frame_signal(rir, n_fft, hop)       # (B, T, n_fft)
    rec_fr = frame_signal(recon, n_fft, hop)
    b, t, n = rir_fr.shape
    nfb, _, two_fb = basis_blocks.shape
    fbk = two_fb // 2
    f_pad = nfb * fbk

    # Stack rir + recon frames into one LHS so the kernel issues one big STFT matmul.
    frames = jnp.concatenate([rir_fr, rec_fr], axis=1).astype(jnp.bfloat16)   # (B, 2T, n_fft)

    # Hoisted constants (trace-time numpy -> passed as inputs with constant index_maps).
    tri = np.triu(np.ones((t, t), np.float32))
    tri2 = jnp.asarray(np.kron(np.eye(2, dtype=np.float32), tri))             # (2T, 2T)
    dmat = jnp.asarray(np.concatenate([np.eye(t, dtype=np.float32),
                                       -np.eye(t, dtype=np.float32)], axis=1))  # (T, 2T)

    partial = pl.pallas_call(
        edr_diff_kernel,
        out_shape=jax.ShapeDtypeStruct((b, 1, f_pad), jnp.float32),
        grid_spec=pltpu.PrefetchScalarGridSpec(
            num_scalar_prefetch=0,
            grid=(b, nfb),                          # f-block axis innermost: frames stay
            in_specs=[                              # resident across it, basis streams.
                pl.BlockSpec((1, 2 * t, n), lambda i, j: (i, 0, 0)),
                pl.BlockSpec((1, n, two_fb), lambda i, j: (j, 0, 0)),
                pl.BlockSpec((2 * t, 2 * t), lambda i, j: (0, 0)),
                pl.BlockSpec((t, 2 * t), lambda i, j: (0, 0)),
            ],
            out_specs=pl.BlockSpec((1, 1, fbk), lambda i, j: (i, 0, j)),
        ),
        compiler_params=pltpu.CompilerParams(
            dimension_semantics=("parallel", "parallel")),
        # TODO(synk): at full size (n_fft=2048, F=1025) the bf16 F-tiled working set is
        # ~2 MB per step, so no vmem_limit_bytes override is needed; raise it only if
        # F_BLOCK is grown to >=512.
    )(frames, basis_blocks, tri2, dmat)

    # Padded bins contribute exactly 0; keep the mean divisor at the original B*T*F.
    return jnp.sum(partial) / (b * t * f_orig)


# ----------------------------------------------------------------------------- reference
def _edr_ref(frames, wcos, wsin):
    real = jnp.einsum("btn,fn->btf", frames, wcos, precision=jax.lax.Precision.HIGHEST)
    imag = jnp.einsum("btn,fn->btf", frames, wsin, precision=jax.lax.Precision.HIGHEST)
    power = real * real + imag * imag
    return jnp.flip(jnp.cumsum(jnp.flip(power, axis=1), axis=1), axis=1)


def log_edr_difference_ref(rir, recon, wcos, wsin, n_fft=N_FFT, hop=HOP):
    e1 = _edr_ref(frame_signal(rir, n_fft, hop), wcos, wsin)
    e2 = _edr_ref(frame_signal(recon, n_fft, hop), wcos, wsin)
    return jnp.mean(jnp.abs(10.0 * jnp.log10((e1 + EPS) / (e2 + EPS))))


if __name__ == "__main__":
    key = jax.random.PRNGKey(0)
    k1, k2 = jax.random.split(key)
    B, L = 2, 2048
    rir = jax.random.normal(k1, (B, L), dtype=jnp.float32)
    recon = jax.random.normal(k2, (B, L), dtype=jnp.float32)

    wcos_np, wsin_np = make_fourier_kernels(N_FFT, SR, FMIN, FMAX)
    basis_blocks, _ = build_basis_blocks(wcos_np, wsin_np, F_BLOCK)

    out = jax.block_until_ready(
        log_edr_difference(rir, recon, basis_blocks, FREQ_BINS))
    ref = jax.block_until_ready(
        log_edr_difference_ref(rir, recon, jnp.asarray(wcos_np), jnp.asarray(wsin_np)))

    assert np.isfinite(float(out))
    assert np.allclose(float(out), float(ref), rtol=1e-2, atol=1e-3), (float(out), float(ref))
    print("KERNEL_OK")
</pallas_src>

<mosaic_0001>
module attributes {stable_mosaic.version = 11 : i64} {
  func.func @edr_diff_kernel(%arg0: i32, %arg1: i32, %arg2: memref<1x18x256xbf16, #tpu.memory_space<vmem>>, %arg3: memref<1x256x256xbf16, #tpu.memory_space<vmem>>, %arg4: memref<18x18xf32, #tpu.memory_space<vmem>>, %arg5: memref<9x18xf32, #tpu.memory_space<vmem>>, %arg6: memref<1x1x128xf32, #tpu.memory_space<vmem>>) attributes {dimension_semantics = [#tpu.dimension_semantics<parallel>, #tpu.dimension_semantics<parallel>], iteration_bounds = array<i64: 2, 2>, scalar_prefetch = 0 : i64, scratch_operands = 0 : i64, tpu.core_type = #tpu.core_type<tc>, window_params = [{transform_indices = @transform_0, window_bounds = array<i64: 1, 18, 256>}, {transform_indices = @transform_1, window_bounds = array<i64: 1, 256, 256>}, {pipeline_mode = #tpu.pipeline_mode<synchronous>, transform_indices = @transform_2, window_bounds = array<i64: 18, 18>}, {pipeline_mode = #tpu.pipeline_mode<synchronous>, transform_indices = @transform_3, window_bounds = array<i64: 9, 18>}, {transform_indices = @transform_4, window_bounds = array<i64: 1, 1, 128>}]} {
    %c0 = arith.constant 0 : index
    %c0_0 = arith.constant 0 : index
    %c0_1 = arith.constant 0 : index
    %0 = vector.load %arg2[%c0, %c0_0, %c0_1] : memref<1x18x256xbf16, #tpu.memory_space<vmem>>, vector<1x18x256xbf16>
    %1 = vector.shape_cast %0 : vector<1x18x256xbf16> to vector<18x256xbf16>
    %c0_2 = arith.constant 0 : index
    %c0_3 = arith.constant 0 : index
    %c0_4 = arith.constant 0 : index
    %2 = vector.load %arg3[%c0_2, %c0_3, %c0_4] : memref<1x256x256xbf16, #tpu.memory_space<vmem>>, vector<1x256x256xbf16>
    %3 = vector.shape_cast %2 : vector<1x256x256xbf16> to vector<256x256xbf16>
    %cst = arith.constant dense<0.000000e+00> : vector<18x256xf32>
    %4 = tpu.matmul %1, %3, %cst {dimension_numbers = #tpu.dot_dimension_numbers<[1], [0], [0], [1], [0, 0, 1, 1], [], []>} : vector<18x256xbf16>, vector<256x256xbf16>, vector<18x256xf32> -> vector<18x256xf32>
    %5 = vector.extract_strided_slice %4 {offsets = [0, 0], sizes = [18, 128], strides = [1, 1]} : vector<18x256xf32> to vector<18x128xf32>
    %6 = vector.extract_strided_slice %4 {offsets = [0, 128], sizes = [18, 128], strides = [1, 1]} : vector<18x256xf32> to vector<18x128xf32>
    %7 = arith.mulf %5, %5 : vector<18x128xf32>
    %8 = arith.mulf %6, %6 : vector<18x128xf32>
    %9 = arith.addf %7, %8 : vector<18x128xf32>
    %c0_5 = arith.constant 0 : index
    %c0_6 = arith.constant 0 : index
    %10 = vector.load %arg4[%c0_5, %c0_6] : memref<18x18xf32, #tpu.memory_space<vmem>>, vector<18x18xf32>
    %cst_7 = arith.constant dense<0.000000e+00> : vector<18x128xf32>
    %11 = tpu.matmul %10, %9, %cst_7 {dimension_numbers = #tpu.dot_dimension_numbers<[1], [0], [0], [1], [0, 0, 1, 1], [], []>} : vector<18x18xf32>, vector<18x128xf32>, vector<18x128xf32> -> vector<18x128xf32>
    %cst_8 = arith.constant 9.99999974E-6 : f32
    %12 = vector.broadcast %cst_8 : f32 to vector<18x128xf32>
    %13 = arith.addf %11, %12 : vector<18x128xf32>
    %14 = math.log %13 : vector<18x128xf32>
    %c0_9 = arith.constant 0 : index
    %c0_10 = arith.constant 0 : index
    %15 = vector.load %arg5[%c0_9, %c0_10] : memref<9x18xf32, #tpu.memory_space<vmem>>, vector<9x18xf32>
    %cst_11 = arith.constant dense<0.000000e+00> : vector<9x128xf32>
    %16 = tpu.matmul %15, %14, %cst_11 {dimension_numbers = #tpu.dot_dimension_numbers<[1], [0], [0], [1], [0, 0, 1, 1], [], []>} : vector<9x18xf32>, vector<18x128xf32>, vector<9x128xf32> -> vector<9x128xf32>
    %17 = math.absf %16 : vector<9x128xf32>
    %cst_12 = arith.constant dense<0.000000e+00> : vector<128xf32>
    %18 = vector.multi_reduction <add>, %17, %cst_12 [0] : vector<9x128xf32> to vector<128xf32>
    %19 = vector.shape_cast %18 : vector<128xf32> to vector<1x128xf32>
    %cst_13 = arith.constant 4.34294462 : f32
    %20 = vector.broadcast %cst_13 : f32 to vector<1x128xf32>
    %21 = arith.mulf %20, %19 : vector<1x128xf32>
    %22 = vector.shape_cast %21 : vector<1x128xf32> to vector<1x1x128xf32>
    %c0_14 = arith.constant 0 : index
    %c0_15 = arith.constant 0 : index
    %c0_16 = arith.constant 0 : index
    %23 = vector.load %arg6[%c0_14, %c0_15, %c0_16] : memref<1x1x128xf32, #tpu.memory_space<vmem>>, vector<1x1x128xf32>
    tpu.vector_store %arg6[%c0_14, %c0_15, %c0_16], %22 {strides = array<i32>} : memref<1x1x128xf32, #tpu.memory_space<vmem>>, vector<1x1x128xf32>,
    return
  }
  func.func @transform_0(%arg0: i32, %arg1: i32) -> (i32, i32, i32) {
    %c0_i32 = arith.constant 0 : i32
    %c0_i32_0 = arith.constant 0 : i32
    %c0_i32_1 = arith.constant 0 : i32
    return %arg0, %c0_i32, %c0_i32_0 : i32, i32, i32
  }
  func.func @transform_1(%arg0: i32, %arg1: i32) -> (i32, i32, i32) {
    %c0_i32 = arith.constant 0 : i32
    %c0_i32_0 = arith.constant 0 : i32
    %c0_i32_1 = arith.constant 0 : i32
    return %arg1, %c0_i32, %c0_i32_0 : i32, i32, i32
  }
  func.func @transform_2(%arg0: i32, %arg1: i32) -> (i32, i32) {
    %c0_i32 = arith.constant 0 : i32
    %c0_i32_0 = arith.constant 0 : i32
    %c0_i32_1 = arith.constant 0 : i32
    return %c0_i32, %c0_i32_0 : i32, i32
  }
  func.func @transform_3(%arg0: i32, %arg1: i32) -> (i32, i32) {
    %c0_i32 = arith.constant 0 : i32
    %c0_i32_0 = arith.constant 0 : i32
    %c0_i32_1 = arith.constant 0 : i32
    return %c0_i32, %c0_i32_0 : i32, i32
  }
  func.func @transform_4(%arg0: i32, %arg1: i32) -> (i32, i32, i32) {
    %c0_i32 = arith.constant 0 : i32
    %c0_i32_0 = arith.constant 0 : i32
    return %arg0, %c0_i32, %arg1 : i32, i32, i32
  }
}

</mosaic_0001>

<bundles_post_ra>
// kernel: tpu_custom_call.1
= control target key start
LH: loop header
LB: loop body
LE: loop exit
PB: predicated region body
PF: predicated region fallthrough
CT: control target
= control target key end

     0   :  { %9 = vsyncpa [#allocation3], 0  ;;  %s1501_s0 = inlined_call_operand.vmem [shape: bf16[2,18,256], index: 0, kind: input, shape index: {}]   ;;  %s1502_s1 = inlined_call_operand.hbm [shape: bf16[2,256,256], index: 1, kind: input, shape index: {}]   ;;  %s1503_s2 = inlined_call_operand.vmem [shape: f32[18,18], index: 2, kind: input, shape index: {}]   ;;  %s1504_s3 = inlined_call_operand.vmem [shape: f32[9,18], index: 3, kind: input, shape index: {}]   ;;  %s1505_s4 = inlined_call_operand.hbm [shape: f32[2,1,256], index: 4, kind: output, shape index: {}]  }
   0x1   :  { %11 = vsyncpa [#allocation3 + $0x1], 0 }
   0x2   :  { %12 = vsyncpa [#allocation4], 0 }
   0x3   :  { %14 = vsyncpa [#allocation4 + $0x1], 0  ;;  %s1235_s15 = smov 0   ;;  %s1237_s16 = smov 0  }
   0x4   :  { %s1239_s17 = smov 0   ;;  %s1241_s18 = smov 0  }
   0x5   :  { %s1243_s19 = smov 0   ;;  %s1245_s20 = smov 0  }
   0x6   :  { %s1247_s21 = smov 0   ;;  %s1249_s22 = smov 0  }
   0x7   :  { %s1251_s23 = smov 0   ;;  %s1253_s24 = smov 0  }
   0x8   :  { %s1255_s25 = smov 0  }
   0x9 LB: > { %1510 = sst [smem:[#allocation8_spill]] %s1198_s23  ;;  %s746_s26 = sadd.s32 4294967295, %s1206_s25   ;;  %s1206_s25 = sphi %s1255_s25, %s20_s25   ;;  %s1202_s24 = sphi %s1253_s24, %s1523_s24   ;;  %s1198_s23 = sphi %s1251_s23, %s1522_s23   ;;  %s1194_s22 = sphi %s1249_s22, %s1521_s22   ;;  %s1190_s21 = sphi %s1247_s21, %s1520_s21   ;;  %s1186_s20 = sphi %s1245_s20, %s1529_s20   ;;  %s1182_s19 = sphi %s1243_s19, %s1528_s19   ;;  %s1178_s18 = sphi %s1241_s18, %s1527_s18   ;;  %s1174_s17 = sphi %s1239_s17, %s1526_s17   ;;  %s1170_s16 = sphi %s1237_s16, %s1525_s16   ;;  %s1166_s15 = sphi %s1235_s15, %s1524_s15  }
   0xa   : > { %1511 = sst [smem:[#allocation9_spill]] %s1202_s24  ;;  %s747_s27 = sadd.s32 4294967294, %s1206_s25  }
   0xb   : > { %s29_s28 = sadd.s32 1, %s1198_s23  ;;  %s32_s29 = sadd.s32 1, %s1202_s24 }
   0xc   : > { %p30_p0 = scmp.ge.s32.totalorder %s29_s28, 2  ;;  %s65_s30 = sadd.s32 1, %s1186_s20 }
   0xd   : > { %p72_p1 = scmp.ne.s32.totalorder %s1186_s20, %s1182_s19  ;;  %p73_p2 = scmp.eq.s32.totalorder %s1206_s25, 0 }
   0xe   : > { %s1531_s28 = smov (%p30_p0, %s29_s28), 0  ;;  %s1533_s29 = smov (!%p30_p0, %s32_s29), %s1202_s24 }
   0xf   : > { %1512 = sst [smem:[#allocation10_spill]] %s1531_s28  ;;  %s62_s5 = ssub.s32 %s1198_s23, %s1531_s28 }
  0x10   : > { %p1301_p3 = por %p73_p2, %p72_p1  ;;  %p34_p4 = scmp.ge.s32.totalorder %s1533_s29, 2 }
  0x11   : > { %p63_p5 = scmp.eq.s32.totalorder %s62_s5, 0  ;;  %p78_p6 = scmp.ne.s32.totalorder %s1182_s19, %s1178_s18 }
  0x12   : > { %p79_p7 = scmp.eq.s32.totalorder %s746_s26, 0  ;;  %s1535_s29 = smov (%p34_p4, %s1533_s29), 0 }
  0x13   : > { %1514 = sst [smem:[#allocation11_spill]] %s1535_s29  ;;  %s130_s9 = ssub.s32 %s1202_s24, %s1535_s29 }
  0x14   : > { %s1309_s7 = scalar_select %p63_p5, %s1186_s20, %s65_s30  }
  0x15   : > { %p1311_p8 = por %p79_p7, %p78_p6  ;;  %s132_s10 = sor.u32 %s130_s9, %s62_s5 }
  0x16   : > { %1515 = sst [smem:[#allocation12_spill]] %s1309_s7  ;;  %s135_s11 = sadd.s32 1, %s1174_s17 }
  0x17   : > { %p133_p9 = scmp.eq.s32.totalorder %s132_s10, 0  ;;  %p145_p10 = scmp.ne.s32.totalorder %s1174_s17, %s1170_s16 }
  0x18   : > { %p146_p11 = scmp.eq.s32.totalorder %s746_s26, 3  ;;  %p151_p12 = scmp.ne.s32.totalorder %s1170_s16, %s1166_s15 }
  0x19   : > { %s1323_s12 = scalar_select %p133_p9, %s1174_s17, %s135_s11  }
  0x1a   : > { %p1325_p13 = por %p146_p11, %p145_p10  ;;  %p152_p0 = scmp.eq.s32.totalorder %s747_s27, 3 }
  0x1b   : > { %p956_p1 = scmp.lt.s32.totalorder %s1206_s25, 4  ;;  %s186_s18 = sand.u32 1, %s1186_s20  }
  0x1c   : > { %p1330_p2 = por %p152_p0, %p151_p12  ;;  %s750_s30 = sshll.u32 %s186_s18, 8 }
  0x1d   : > { %s902_s5 = sshll.u32 %s1198_s23, 8  ;;  %s190_s11 = scalar_lea.vmem [#allocation2], %s750_s30 }
  0x1e   : > { %s195_s10 = scalar_lea.hbm %s1502_s1, %s902_s5  ;;  %s198_s29 = sshll.u32 %s190_s11, 4  ;;  %s199_s29 = int_to_ptr.vmem [resolvable:$true] %s198_s29 }
  0x1f   : > { %s196_s28 = sshll.u32 %s195_s10, 4  ;;  %p949_p4 = pnand %p956_p1, %p1301_p3  ;;  %s197_s28 = int_to_ptr.hbm [resolvable:$true] %s196_s28 }
  0x20   : > { %p753_p5 = scmp.ge.s32.totalorder %s1206_s25, 1  ;;  %s187_s27 = scalar_lea.sflag [#allocation3], %s186_s18 }
  0x21   : > { %s1208_s24 = smov 128   ;;  %s1209_s7 = smov 8  }
  0x22   : > { %951 = dma.hbm_to_vmem [thread:$0]  (!%p949_p4), %s197_s28, 4096, %s199_s29, %s187_s27, %s1208_s24, %s1208_s24, %s1209_s7  }
  0x23   : > { %p206_p6 = scmp.lt.s32.totalorder %s1206_s25, 5 }
  0x25   : > { %p207_p7 = pnand %p753_p5, %p206_p6 }
  0x26   : > { %s212_s23 = sand.u32 (!%p207_p7), 1, %s1182_s19  }
  0x27   : > { %210 = sbr.rel (%p207_p7) target bundleno = 551 (0x227), region = 36  ;;  %s754_s26 = sshll.u32 (!%p207_p7), %s212_s23, 8 }
  0x28   : > { %s213_s5 = scalar_lea.sflag (!%p207_p7), [#allocation3], %s212_s23  ;;  %s1344_s30 = scalar_lea.vmem (!%p207_p7), [#allocation2], %s754_s26 }
  0x2c   : > { %1157 = dma.done.wait (%p1311_p8), %s213_s5, 4096  }
  0x2d   : > { %1159 = vsyncadd (%p1311_p8), %s213_s5, 4294963200  ;;  %v822_v0 = vld [vmem:[%s1344_s30 + $0x70] sm:$0xf]  ;;  %v920_v1 = vld [vmem:[%s1344_s30 + $0x74] sm:$0xf0]  ;;  %p246_p3 = scmp.lt.s32.totalorder %s1194_s22, 1 }
  0x2e   : > { %v886_v2 = vld [vmem:[%s1344_s30 + $0xf0] sm:$0xf]  ;;  %v823_v3 = vor.u32 %v920_v1, %v822_v0  ;;  %v936_v4 = vld [vmem:[%s1344_s30 + $0xf4] sm:$0xf0]  ;;  %v919_v5 = vld [vmem:[%s1344_s30 + $0x74] sm:$0xf] }
  0x2f   : > { %v824_v6 = vld [vmem:[%s1344_s30 + $0x78] sm:$0xf0]  ;;  %v887_v7 = vor.u32 %v936_v4, %v886_v2  ;;  %v935_v9 = vld [vmem:[%s1344_s30 + $0xf4] sm:$0xf]  ;;  %v814_v11 = vld [vmem:[%s1344_s30 + $0x60] sm:$0xf] }
  0x30   : > { %v827_v8 = vor.u32 %v919_v5, %v824_v6  ;;  %v888_v10 = vld [vmem:[%s1344_s30 + $0xf8] sm:$0xf0]  ;;  %463 = vmatpush.bf16.msra.mxu0 %v823_v3  ;;  %v918_v13 = vld [vmem:[%s1344_s30 + $0x64] sm:$0xf0]  ;;  %v878_v14 = vld [vmem:[%s1344_s30 + $0xe0] sm:$0xf] }
  0x31   : > { %v891_v12 = vor.u32 %v935_v9, %v888_v10  ;;  %v934_v15 = vld [vmem:[%s1344_s30 + $0xe4] sm:$0xf0]  ;;  %481 = vmatpush.bf16.msra.mxu1 %v887_v7  ;;  %v815_v16 = vor.u32 %v918_v13, %v814_v11  ;;  %v917_v18 = vld [vmem:[%s1344_s30 + $0x64] sm:$0xf]  ;;  %v816_v19 = vld [vmem:[%s1344_s30 + $0x68] sm:$0xf0] }
  0x32   : > { %499 = vmatpush.bf16.msra.mxu2 %v827_v8  ;;  %v879_v17 = vor.u32 %v934_v15, %v878_v14  ;;  %v933_v20 = vld [vmem:[%s1344_s30 + $0xe4] sm:$0xf]  ;;  %v819_v21 = vor.u32 %v917_v18, %v816_v19  ;;  %v880_v22 = vld [vmem:[%s1344_s30 + $0xe8] sm:$0xf0]  ;;  %v806_v23 = vld [vmem:[%s1344_s30 + $0x50] sm:$0xf] }
  0x33   : > { %517 = vmatpush.bf16.msra.mxu3 %v891_v12  ;;  %v916_v24 = vld [vmem:[%s1344_s30 + $0x54] sm:$0xf0]  ;;  %v883_v25 = vor.u32 %v933_v20, %v880_v22  ;;  %v870_v26 = vld [vmem:[%s1344_s30 + $0xd0] sm:$0xf]  ;;  %v915_v28 = vld [vmem:[%s1344_s30 + $0x54] sm:$0xf] }
  0x34   : > { %v932_v27 = vld [vmem:[%s1344_s30 + $0xd4] sm:$0xf0]  ;;  %464 = vmatpush.bf16.msra.mxu0 %v815_v16  ;;  %v807_v29 = vor.u32 %v916_v24, %v806_v23  ;;  %v808_v30 = vld [vmem:[%s1344_s30 + $0x58] sm:$0xf0]  ;;  %v931_v31 = vld [vmem:[%s1344_s30 + $0xd4] sm:$0xf] }
  0x35   : > { %v872_v32 = vld [vmem:[%s1344_s30 + $0xd8] sm:$0xf0]  ;;  %482 = vmatpush.bf16.msra.mxu1 %v879_v17  ;;  %v871_v33 = vor.u32 %v932_v27, %v870_v26  ;;  %v811_v34 = vor.u32 %v915_v28, %v808_v30  ;;  %v798_v35 = vld [vmem:[%s1344_s30 + $0x40] sm:$0xf]  ;;  %v914_v36 = vld [vmem:[%s1344_s30 + $0x44] sm:$0xf0] }
  0x36   : > { %500 = vmatpush.bf16.msra.mxu2 %v819_v21  ;;  %v862_v37 = vld [vmem:[%s1344_s30 + $0xc0] sm:$0xf]  ;;  %v875_v38 = vor.u32 %v931_v31, %v872_v32  ;;  %v930_v39 = vld [vmem:[%s1344_s30 + $0xc4] sm:$0xf0]  ;;  %v913_v40 = vld [vmem:[%s1344_s30 + $0x44] sm:$0xf]  ;;  %v799_v44 = vor.u32 %v914_v36, %v798_v35 }
  0x37   : > { %518 = vmatpush.bf16.msra.mxu3 %v883_v25  ;;  %v800_v41 = vld [vmem:[%s1344_s30 + $0x48] sm:$0xf0]  ;;  %v929_v42 = vld [vmem:[%s1344_s30 + $0xc4] sm:$0xf]  ;;  %v863_v45 = vor.u32 %v930_v39, %v862_v37  ;;  %v790_v47 = vld [vmem:[%s1344_s30 + $0x30] sm:$0xf] }
  0x38   : > { %v864_v43 = vld [vmem:[%s1344_s30 + $0xc8] sm:$0xf0]  ;;  %465 = vmatpush.bf16.msra.mxu0 %v807_v29  ;;  %v803_v46 = vor.u32 %v913_v40, %v800_v41  ;;  %v912_v48 = vld [vmem:[%s1344_s30 + $0x34] sm:$0xf0]  ;;  %v854_v49 = vld [vmem:[%s1344_s30 + $0xb0] sm:$0xf] }
  0x39   : > { %483 = vmatpush.bf16.msra.mxu1 %v871_v33  ;;  %v867_v50 = vor.u32 %v929_v42, %v864_v43  ;;  %v928_v51 = vld [vmem:[%s1344_s30 + $0xb4] sm:$0xf0]  ;;  %v911_v52 = vld [vmem:[%s1344_s30 + $0x34] sm:$0xf]  ;;  %v792_v53 = vld [vmem:[%s1344_s30 + $0x38] sm:$0xf0]  ;;  %v791_v56 = vor.u32 %v912_v48, %v790_v47 }
  0x3a   : > { %501 = vmatpush.bf16.msra.mxu2 %v811_v34  ;;  %v927_v54 = vld [vmem:[%s1344_s30 + $0xb4] sm:$0xf]  ;;  %v856_v55 = vld [vmem:[%s1344_s30 + $0xb8] sm:$0xf0]  ;;  %s1394_s23 = scalar_select %p246_p3, %s1194_s22, 1  ;;  %v855_v57 = vor.u32 %v928_v51, %v854_v49  ;;  %v795_v58 = vor.u32 %v911_v52, %v792_v53  ;;  %vm557_vm0 = vcmask 1041408  }
  0x3b   : > { %519 = vmatpush.bf16.msra.mxu3 %v875_v38  ;;  %v782_v59 = vld [vmem:[%s1344_s30 + $0x20] sm:$0xf]  ;;  %v910_v60 = vld [vmem:[%s1344_s30 + $0x24] sm:$0xf0]  ;;  %v859_v62 = vor.u32 %v927_v54, %v856_v55  ;;  %v909_v0 = vld [vmem:[%s1344_s30 + $0x24] sm:$0xf] }
  0x3c   : > { %466 = vmatpush.bf16.msra.mxu0 %v799_v44  ;;  %v846_v61 = vld [vmem:[%s1344_s30 + $0xa0] sm:$0xf]  ;;  %v926_v63 = vld [vmem:[%s1344_s30 + $0xa4] sm:$0xf0]  ;;  %v784_v1 = vld [vmem:[%s1344_s30 + $0x28] sm:$0xf0]  ;;  %v783_v4 = vor.u32 %v910_v60, %v782_v59 }
  0x3d   : > { %484 = vmatpush.bf16.msra.mxu1 %v863_v45  ;;  %v925_v2 = vld [vmem:[%s1344_s30 + $0xa4] sm:$0xf]  ;;  %v848_v3 = vld [vmem:[%s1344_s30 + $0xa8] sm:$0xf0]  ;;  %s943_s24 = smul.u32 24, %s1394_s23  ;;  %v847_v5 = vor.u32 %v926_v63, %v846_v61  ;;  %v787_v6 = vor.u32 %v909_v0, %v784_v1  ;;  %vm547_vm1 = vcmask 146432  }
  0x3e   : > { %502 = vmatpush.bf16.msra.mxu2 %v803_v46  ;;  %v774_v7 = vld [vmem:[%s1344_s30 + $0x10] sm:$0xf]  ;;  %v908_v8 = vld [vmem:[%s1344_s30 + $0x14] sm:$0xf0]  ;;  %v851_v10 = vor.u32 %v925_v2, %v848_v3  ;;  %v907_v12 = vld [vmem:[%s1344_s30 + $0x14] sm:$0xf] }
  0x3f   : > { %520 = vmatpush.bf16.msra.mxu3 %v867_v50  ;;  %v838_v9 = vld [vmem:[%s1344_s30 + $0x90] sm:$0xf]  ;;  %v924_v11 = vld [vmem:[%s1344_s30 + $0x94] sm:$0xf0]  ;;  %v776_v13 = vld [vmem:[%s1344_s30 + $0x18] sm:$0xf0]  ;;  %v775_v16 = vor.u32 %v908_v8, %v774_v7  ;;  %s250_s6 = scalar_lea.vmem %s1501_s0, %s943_s24 }
  0x40   : > { %467 = vmatpush.bf16.msra.mxu0 %v791_v56  ;;  %v923_v14 = vld [vmem:[%s1344_s30 + $0x94] sm:$0xf]  ;;  %v840_v15 = vld [vmem:[%s1344_s30 + $0x98] sm:$0xf0]  ;;  %v839_v17 = vor.u32 %v924_v11, %v838_v9  ;;  %v779_v18 = vor.u32 %v907_v12, %v776_v13  ;;  %v766_v19 = vld [vmem:[%s1344_s30] sm:$0xf] }
  0x41   : > { %485 = vmatpush.bf16.msra.mxu1 %v855_v57  ;;  %v906_v20 = vld [vmem:[%s1344_s30 + $0x4] sm:$0xf0]  ;;  %v830_v21 = vld [vmem:[%s1344_s30 + $0x80] sm:$0xf]  ;;  %v843_v22 = vor.u32 %v923_v14, %v840_v15  ;;  %v905_v24 = vld [vmem:[%s1344_s30 + $0x4] sm:$0xf] }
  0x42   : > { %503 = vmatpush.bf16.msra.mxu2 %v795_v58  ;;  %v922_v23 = vld [vmem:[%s1344_s30 + $0x84] sm:$0xf0]  ;;  %v768_v25 = vld [vmem:[%s1344_s30 + $0x8] sm:$0xf0]  ;;  %v921_v26 = vld [vmem:[%s1344_s30 + $0x84] sm:$0xf]  ;;  %v767_v28 = vor.u32 %v906_v20, %v766_v19 }
  0x43   : > { %521 = vmatpush.bf16.msra.mxu3 %v859_v62  ;;  %v832_v27 = vld [vmem:[%s1344_s30 + $0x88] sm:$0xf0]  ;;  %v758_v29 = vld [vmem:[%s250_s6] sm:$0xf]  ;;  %v904_v30 = vld [vmem:[%s250_s6 + $0x4] sm:$0xf0]  ;;  %v831_v31 = vor.u32 %v922_v23, %v830_v21  ;;  %v771_v32 = vor.u32 %v905_v24, %v768_v25 }
  0x44   : > { %468 = vmatpush.bf16.msra.mxu0 %v783_v4  ;;  %v903_v33 = vld [vmem:[%s250_s6 + $0x4] sm:$0xf]  ;;  %v760_v34 = vld [vmem:[%s250_s6 + $0x8] sm:$0xf0]  ;;  %v835_v35 = vor.u32 %v921_v26, %v832_v27  ;;  %v759_v36 = vor.u32 %v904_v30, %v758_v29  ;;  %v253_v38 = vld [vmem:[%s250_s6 + $0x10] sm:$0x11] }
  0x45   : > { %486 = vmatpush.bf16.msra.mxu1 %v847_v5  ;;  %v763_v37 = vor.u32 %v903_v33, %v760_v34  ;;  %v293_v39 = vunpack.c.l.b16 %v253_v38  ;;  %v294_v40 = vunpack.c.h.b16 %v253_v38  ;;  %v544_v11 = vld [vmem:[%s1503_s2] sm:$0xff]  ;;  %v546_v12 = vld [vmem:[%s1503_s2 + $0x10] sm:$0x3]  ;;  %v594_v25 = vld [vmem:[%s1504_s3 + $0x8] sm:$0x1]  ;;  %vm629_vm2 = vcmask 1040384  }
  0x46   : > { %504 = vmatpush.bf16.msra.mxu2 %v787_v6  ;;  %v593_v26 = vld [vmem:[%s1504_s3] sm:$0xff]  ;;  %s899_s23 = sshll.u32 %s1194_s22, 1  ;;  %s244_s24 = sand.u32 1, %s1170_s16  }
  0x47   : > { %522 = vmatpush.bf16.msra.mxu3 %v851_v10  ;;  %v297_v41 = vpack.c.b16 %v293_v39, %v293_v39  ;;  %v298_v42 = vpack.c.b16 %v294_v40, %v294_v40  ;;  %v545_v10 = vld [vmem:[%s1503_s2 + $0x8] sm:$0xff]  ;;  %s650_s28 = sadd.s32 %s1190_s21, %s899_s23  ;;  %s245_s8 = scalar_lea.vmem [#allocation5], %s244_s24 }
  0x48   : > { %469 = vmatpush.bf16.msra.mxu0 %v775_v16  ;;  %s651_s7 = scalar_lea.hbm %s1505_s4, %s650_s28  ;;  %s653_s18 = sshll.u32 %s245_s8, 4  ;;  %s654_s18 = int_to_ptr.vmem [resolvable:$true] %s653_s18 }
  0x49   : > { %487 = vmatpush.bf16.msra.mxu1 %v839_v17  ;;  %s655_s9 = sshll.u32 %s651_s7, 4  ;;  %s641_s22 = scalar_lea.sflag [#allocation4], %s244_s24  ;;  %s656_s9 = int_to_ptr.hbm [resolvable:$true] %s655_s9 }
  0x4a   : > { %505 = vmatpush.bf16.msra.mxu2 %v779_v18  ;;  %s1098_s10 = sshra.s32 %s656_s9, 4  ;;  %s1104_s26 = scalar_lea.hbm %s1505_s4, 4  ;;  %s1099_s10 = int_to_ptr.hbm [resolvable:$true] %s1098_s10 }
  0x4b   : > { %523 = vmatpush.bf16.msra.mxu3 %v843_v22  ;;  %s1100_s21 = scalar_lea.hbm %s1099_s10, 1  ;;  %p1105_p11 = scmp.lt.s32.totalorder %s1099_s10, %s1505_s4 }
  0x4c   : > { %470 = vmatpush.bf16.msra.mxu0 %v767_v28  ;;  %p1101_p8 = scmp.ne.s32.totalorder %s1099_s10, %s1100_s21  ;;  %p1106_p12 = scmp.lt.s32.totalorder %s1104_s26, %s1100_s21 }
  0x4d   : > { %488 = vmatpush.bf16.msra.mxu1 %v831_v31 }
  0x4e   : > { %506 = vmatpush.bf16.msra.mxu2 %v771_v32  ;;  %p1102_p9 = pnand %p1101_p8, %p1325_p13  ;;  %p1107_p0 = por %p1106_p12, %p1105_p11 }
  0x4f   : > { %524 = vmatpush.bf16.msra.mxu3 %v835_v35  ;;  %471 = vmatmul.bf16.vlgmr.msra.gmra.mxu0 %v759_v36 }
  0x50   : > { %489 = vmatmul.bf16.vlgmr.msra.gmra.mxu1 %v763_v37  ;;  %p1103_p10 = pneg %p1102_p9 }
  0x51   : > { %507 = vmatmul.bf16.vlgmr.msra.gmra.mxu2 %v759_v36 }
  0x52   : > { %525 = vmatmul.bf16.vlgmr.msra.gmra.mxu3 %v763_v37  ;;  %p1108_p1 = pnand %p1107_p0, %p1103_p10 }
  0x5f   : > { %476 = vmatmul.bf16.gmra.mxu0 %v297_v41 }
  0x60   : > { %494 = vmatmul.bf16.gmra.mxu1 %v298_v42 }
  0x61   : > { %512 = vmatmul.bf16.gmra.mxu2 %v297_v41 }
  0x62   : > { %530 = vmatmul.bf16.gmra.mxu3 %v298_v42 }
  0xcc   : > { %v472_v43 = vpop.f32.mrf.mxu0 }
  0xcd   : > { %v490_v44 = vpop.f32.mrf.mxu1 }
  0xce   : > { %v491_v56 = vadd.f32 %v490_v44, %v472_v43 }
  0xd0   : > { %v535_v2 = vmul.f32 %v491_v56, %v491_v56 }
  0xd4   : > { %v508_v45 = vpop.f32.mrf.mxu2  ;;  %v474_v47 = vpop.f32.mrf.mxu0 }
  0xd5   : > { %v526_v46 = vpop.f32.mrf.mxu3  ;;  %v492_v48 = vpop.f32.mrf.mxu1 }
  0xd6   : > { %v527_v59 = vadd.f32 %v526_v46, %v508_v45  ;;  %v493_v60 = vadd.f32 %v492_v48, %v474_v47 }
  0xd8   : > { %v538_v3 = vmul.f32 %v527_v59, %v527_v59  ;;  %v536_v4 = vmul.f32 %v493_v60, %v493_v60 }
  0xda   : > { %v541_v9 = vadd.f32 %v538_v3, %v535_v2 }
  0xdc   : > { %v510_v49 = vpop.f32.mrf.mxu2  ;;  %v477_v51 = vpop.f32.mrf.mxu0 }
  0xdd   : > { %v528_v50 = vpop.f32.mrf.mxu3  ;;  %v495_v52 = vpop.f32.mrf.mxu1 }
  0xde   : > { %v496_v53 = vadd.f32 %v495_v52, %v477_v51  ;;  %v529_v54 = vadd.f32 %v528_v50, %v510_v49 }
  0xe0   : > { %v537_v61 = vmul.f32 %v496_v53, %v496_v53  ;;  %v539_v0 = vmul.f32 %v529_v54, %v529_v54 }
  0xe2   : > { %v542_v7 = vadd.f32 %v539_v0, %v536_v4 }
  0xe4   : > { %v513_v55 = vpop.f32.mrf.mxu2  ;;  %v479_v58 = vpop.f32.mrf.mxu0 }
  0xe5   : > { %v531_v57 = vpop.f32.mrf.mxu3  ;;  %v497_v63 = vpop.f32.mrf.mxu1 }
  0xe6   : > { %v532_v62 = vadd.f32 %v531_v57, %v513_v55 }
  0xe8   : > { %v540_v1 = vmul.f32 %v532_v62, %v532_v62 }
  0xea   : > { %v543_v5 = vadd.f32 %v540_v1, %v537_v61 }
  0xec   : > { %892 = vmatpush.msk.msrb.mxu0 %vm557_vm0, %v543_v5  ;;  %937 = vmatpush.msk.msrb.mxu2 %vm557_vm0, %v543_v5  ;;  %v515_v6 = vpop.f32.mrf.mxu2 }
  0xed   : > { %v533_v8 = vpop.f32.mrf.mxu3 }
  0xee   : > { %575 = vmatpush.msrb.mxu0 %v542_v7  ;;  %938 = vmatpush.msrb.mxu2 %v542_v7 }
  0xf0   : > { %576 = vmatpush.msrb.mxu0 %v541_v9  ;;  %939 = vmatpush.msrb.mxu2 %v541_v9 }
  0xf1   : > { %894 = vmatmul.msk.f32.vlgmr.msrb.gmra.mxu2 %vm547_vm1, %v545_v10  ;;  %893 = vmatmul.msk.f32.vlgmr.msrb.gmra.mxu0 %vm547_vm1, %v544_v11 }
  0xf9   : > { %895 = vmatmul.msk.f32.gmra.mxu2 %vm547_vm1, %v546_v12 }
 0x16e   : > { %v578_v14 = vpop.f32.mrf.mxu0 }
 0x16f   : > { %v579_v15 = vadd.f32 1e-05, %v578_v14 }
 0x171   : > { %1048 = vlog2.f32 %v579_v15 }
 0x174   : > { %v581_v13 = vpop.f32.mrf.mxu2 }
 0x175   : > { %v582_v16 = vadd.f32 1e-05, %v581_v13 }
 0x177   : > { %1050 = vlog2.f32 %v582_v16  ;;  %v1049_v19 = vpop.eup %1048 }
 0x178   : > { %v588_v24 = vmul.f32 0.6931472, %v1049_v19 }
 0x17c   : > { %v584_v17 = vpop.f32.mrf.mxu2 }
 0x17d   : > { %v585_v18 = vadd.f32 1e-05, %v584_v17  ;;  %v1051_v20 = vpop.eup %1050 }
 0x17e   : > { %v590_v23 = vmul.f32 0.6931472, %v1051_v20 }
 0x17f   : > { %1052 = vlog2.f32 %v585_v18 }
 0x185   : > { %v1053_v21 = vpop.eup %1052 }
 0x186   : > { %v592_v22 = vmul.f32 0.6931472, %v1053_v21 }
 0x188   : > { %896 = vmatpush.msk.msrb.mxu1 %vm557_vm0, %v592_v22  ;;  %940 = vmatpush.msk.msrb.mxu3 %vm557_vm0, %v592_v22 }
 0x18a   : > { %618 = vmatpush.msrb.mxu1 %v590_v23  ;;  %941 = vmatpush.msrb.mxu3 %v590_v23 }
 0x18c   : > { %619 = vmatpush.msrb.mxu1 %v588_v24  ;;  %942 = vmatpush.msrb.mxu3 %v588_v24 }
 0x18d   : > { %898 = vmatmul.msk.f32.vlgmr.msrb.gmra.mxu3 %vm547_vm1, %v594_v25  ;;  %897 = vmatmul.msk.f32.vlgmr.msrb.gmra.mxu1 %vm547_vm1, %v593_v26 }
 0x20a   : > { %v621_v27 = vpop.f32.mrf.mxu1 }
 0x20b   : > { %v627_v29 = vand.u32 2147483647, %v621_v27 }
 0x210   : > { %v624_v28 = vpop.f32.mrf.mxu3 }
 0x211   : > { %v628_v30 = vand.u32 2147483647, %v624_v28 }
 0x213   : > { %v630_v31 = vsel %vm629_vm2, %v628_v30, 0.0 }
 0x214   : > { %v631_v32 = vadd.f32 %v630_v31, %v627_v29 }
 0x216   : > { %v632_v33 = vrot.slane %v631_v32, 4 }
 0x218   : > { %v633_v34 = vadd.f32 %v632_v33, %v631_v32 }
 0x21a   : > { %v634_v35 = vrot.slane %v633_v34, 2 }
 0x21c   : > { %v635_v36 = vadd.f32 %v634_v35, %v633_v34 }
 0x21e   : > { %v636_v37 = vrot.slane %v635_v36, 1 }
 0x220   : > { %v637_v38 = vadd.f32 %v636_v37, %v635_v36 }
 0x222   : > { %v638_v39 = vmul.f32 4.3429446, %v637_v38 }
 0x224   : > { %639 = vst [vmem:[%s245_s8] sm:$0x1] %v638_v39 }
 0x225   : > { %1111 = shalt.err (!%p1108_p1)
}
 0x226   : > { %946 = dma.vmem_to_hbm [thread:$0]  (%p1325_p13), %s654_s18, 16, %s656_s9, %s641_s22  }
 0x227 PF: > { %p957_p4 = scmp.ge.s32.totalorder %s1206_s25, 2  ;;  %s667_s23 = sand.u32 1, %s1166_s15  }
 0x228   : > { %s668_s24 = scalar_lea.sflag [#allocation4], %s667_s23 }
 0x229   : > { %p953_p5 = pnand %p957_p4, %p1330_p2 }
 0x22b   : > { %p954_p6 = pneg %p953_p5 }
 0x22d   : > { %1161 = dma.done.wait (%p954_p6), %s668_s24, 16  }
 0x22e   : > { %1163 = vsyncadd (%p954_p6), %s668_s24, 4294967280  ;;  %s20_s25 = sadd.s32 1, %s1206_s25   ;;  %s1519_s13 = sld [smem:[#allocation12_spill]] }
 0x22f   : > { %p17_p7 = scmp.ge.s32.totalorder %s20_s25, 6   ;;  %s1520_s21 = sld [smem:[#allocation8_spill]] }
 0x230   : > { %s1521_s22 = sld [smem:[#allocation9_spill]]  ;;  %s1524_s15 = smov %s1170_s16 }
 0x231   : > { %s1522_s23 = sld [smem:[#allocation10_spill]]  ;;  %s1525_s16 = smov %s1174_s17 }
 0x232   : > { %s1523_s24 = sld [smem:[#allocation11_spill]]  ;;  %s1526_s17 = smov %s1323_s12 }
 0x233   : > { %s1527_s18 = smov %s1182_s19  ;;  %s1528_s19 = smov %s1186_s20 }
 0x234   : > { %s1529_s20 = smov %s1519_s13  ;;  %19 = sbr.rel (!%p17_p7) target bundleno = 9 (0x9), region = 84 }
 0x239   :  { %673 = vsyncpa [#allocation3], 1 }
 0x23a   :  { %675 = vsyncpa [#allocation3 + $0x1], 1 }
 0x23b   :  { %676 = vsyncpa [#allocation4], 1 }
 0x23c   :  { %678 = vsyncpa [#allocation4 + $0x1], 1 }

</bundles_post_ra>
